<compile_context>
chip_gen: v5e
topology: v5e:2x2
jax: 0.10.0
libtpu: 0.0.40
codegen_flags: <defaults>
</compile_context>

<pallas_src>
import jax
import jax.numpy as jnp
from jax import lax
from jax.experimental import pallas as pl
from jax.experimental.pallas import tpu as pltpu


def _make_kernel(T, H, O, LANE):
    H2 = 2 * H
    r_wih = T
    r_whh = r_wih + LANE
    r_wo = r_whh + LANE
    r_bo = r_wo + LANE
    r_h0 = r_bo + 1

    def kernel(slab_ref, out_ref):
        # Static row-slices of the single resident slab (no further DMAs).
        xaug = slab_ref[0:T, :]                    # (T, LANE)  [x | x_rev | 1 | 0..]
        wih = slab_ref[r_wih:r_wih + LANE, :]      # (LANE, LANE) block-diag W_ih^T + bias row
        whh = slab_ref[r_whh:r_whh + LANE, :]      # (LANE, LANE) block-diag W_hh^T (zero-padded)
        wout = slab_ref[r_wo:r_wo + LANE, :]       # (LANE, LANE) W_out^T (zero-padded)
        bout = slab_ref[r_bo:r_bo + 1, :]          # (1, LANE)
        h = slab_ref[r_h0:r_h0 + 1, :]             # (1, LANE)   [h0_f | h0_b | 0..]

        # Hoisted input projection: one MXU op covers every timestep of both
        # directions; biases are folded in via the ones column / bias row.
        # Row t = [x_t @ Wih_f^T + b_f  |  x_{T-1-t} @ Wih_b^T + b_b | 0..].
        xw = jnp.dot(xaug, wih, preferred_element_type=jnp.float32)   # (T, LANE)

        # Statically unrolled recurrence: one block-diag dot + one fused tanh
        # per step on the serial chain; slices of xw are static. Padded lanes
        # stay exactly zero (zero cols in whh, zero lanes in xw, tanh(0)=0).
        # TODO(synk): weight-stationary MXU (matmul_push_rhs/acc_lhs) not used;
        # jnp.dot re-streams the small RHS each step, acceptable at this size.
        for t in range(T):
            h = jnp.tanh(xw[t:t + 1, :]
                         + jnp.dot(h, whh, preferred_element_type=jnp.float32))

        # Row 1 of the merged output: full-lane write of [h_f | h_b],
        # no cross-lane move needed.
        out_ref[1:2, :] = h

        # Linear on cat(hidden[0], hidden[1], dim=1): h is already that concat.
        logits = jnp.dot(h, wout, preferred_element_type=jnp.float32) + bout

        # Dropout(p=0.1) is identity in inference mode.
        # TODO(synk): training-mode stochastic dropout not implemented.

        # LogSoftmax(dim=1), numerically stable; mask padded lanes if any.
        if O < LANE:
            lane = lax.broadcasted_iota(jnp.int32, (1, LANE), 1)
            logits = jnp.where(lane < O, logits, -jnp.inf)
        m = jnp.max(logits, axis=1, keepdims=True)
        shifted = logits - m
        lse = jnp.log(jnp.sum(jnp.exp(shifted), axis=1, keepdims=True))
        res = shifted - lse
        if O < LANE:
            res = jnp.where(lane < O, res, 0.0)
        out_ref[0:1, :] = res

    return kernel


@jax.jit
def rnn_light_forward(x, h0, params):
    T, I = x.shape
    H = params["w_hh_f"].shape[0]
    O = params["w_out"].shape[0]
    H2 = 2 * H
    LANE = max(H2, O, 2 * I + 1)

    # ---- pack everything into one f32 slab (plain JAX glue, once per call) ----
    # rows [0,T): x augmented with its time reversal and a ones column (bias).
    xaug = jnp.zeros((T, LANE), jnp.float32)
    xaug = xaug.at[:, :I].set(x)
    xaug = xaug.at[:, I:2 * I].set(x[::-1])
    xaug = xaug.at[:, 2 * I].set(1.0)

    # rows [T, T+LANE): block-diagonal input weights with fused bias row.
    wih = jnp.zeros((LANE, LANE), jnp.float32)
    wih = wih.at[:I, :H].set(params["w_ih_f"].T)
    wih = wih.at[I:2 * I, H:H2].set(params["w_ih_b"].T)
    wih = wih.at[2 * I, :H].set(params["b_ih_f"] + params["b_hh_f"])
    wih = wih.at[2 * I, H:H2].set(params["b_ih_b"] + params["b_hh_b"])

    # rows [T+LANE, T+2*LANE): block-diagonal recurrent weights.
    whh = jnp.zeros((LANE, LANE), jnp.float32)
    whh = whh.at[:H, :H].set(params["w_hh_f"].T)
    whh = whh.at[H:H2, H:H2].set(params["w_hh_b"].T)

    # rows [T+2*LANE, T+3*LANE): output weights; then output bias; then h0.
    wout = jnp.zeros((LANE, LANE), jnp.float32)
    wout = wout.at[:H2, :O].set(params["w_out"].T)

    bout = jnp.zeros((1, LANE), jnp.float32).at[0, :O].set(params["b_out"])

    h0row = jnp.zeros((1, LANE), jnp.float32)
    h0row = h0row.at[0, :H].set(h0[0, 0])
    h0row = h0row.at[0, H:H2].set(h0[1, 0])

    slab = jnp.concatenate([xaug, wih, whh, wout, bout, h0row], axis=0)

    vmem = pl.BlockSpec(memory_space=pltpu.MemorySpace.VMEM)
    res = pl.pallas_call(
        _make_kernel(T, H, O, LANE),
        out_shape=jax.ShapeDtypeStruct((2, LANE), jnp.float32),
        in_specs=[vmem],
        out_specs=vmem,
    )(slab)
    # TODO(synk): if batches of independent sequences ever appear, add a leading
    # "parallel" grid axis (engages the 2nd TensorCore on v7x and amortizes the
    # per-call overhead everywhere).

    out = res[0:1, :O]                                       # (1, O) log-softmax
    hidden = jnp.stack([res[1:2, :H], res[1:2, H:H2]])       # (2, 1, H) like nn.RNN
    return out, hidden


def rnn_light_reference(x, h0, params):
    """Pure-JAX reference reproducing the PyTorch forward (eval mode)."""
    def run_dir(xs, h, wih, whh, bih, bhh):
        def step(h, xt):
            return jnp.tanh(xt @ wih.T + h @ whh.T + bih + bhh), None
        h, _ = lax.scan(step, h, xs)
        return h
    h_f = run_dir(x, h0[0], params["w_ih_f"], params["w_hh_f"],
                  params["b_ih_f"], params["b_hh_f"])
    h_b = run_dir(x[::-1], h0[1], params["w_ih_b"], params["w_hh_b"],
                  params["b_ih_b"], params["b_hh_b"])
    hidden = jnp.stack([h_f, h_b], axis=0)
    concat = jnp.concatenate([h_f, h_b], axis=1)
    logits = concat @ params["w_out"].T + params["b_out"]
    out = jax.nn.log_softmax(logits, axis=1)
    return out, hidden


if __name__ == "__main__":
    INPUT_SIZE, HIDDEN_SIZE, OUTPUT_SIZE, SEQ_LEN = 16, 32, 64, 8

    key = jax.random.PRNGKey(0)
    keys = jax.random.split(key, 11)
    bound = float(1.0 / (HIDDEN_SIZE ** 0.5))

    def u(k, shape):
        return jax.random.uniform(k, shape, jnp.float32, -bound, bound)

    params = {
        "w_ih_f": u(keys[0], (HIDDEN_SIZE, INPUT_SIZE)),
        "w_hh_f": u(keys[1], (HIDDEN_SIZE, HIDDEN_SIZE)),
        "b_ih_f": u(keys[2], (HIDDEN_SIZE,)),
        "b_hh_f": u(keys[3], (HIDDEN_SIZE,)),
        "w_ih_b": u(keys[4], (HIDDEN_SIZE, INPUT_SIZE)),
        "w_hh_b": u(keys[5], (HIDDEN_SIZE, HIDDEN_SIZE)),
        "b_ih_b": u(keys[6], (HIDDEN_SIZE,)),
        "b_hh_b": u(keys[7], (HIDDEN_SIZE,)),
        "w_out":  u(keys[8], (OUTPUT_SIZE, 2 * HIDDEN_SIZE)),
        "b_out":  u(keys[9], (OUTPUT_SIZE,)),
    }

    x = jax.random.normal(keys[10], (SEQ_LEN, INPUT_SIZE), jnp.float32)
    h0 = jnp.zeros((2, 1, HIDDEN_SIZE), jnp.float32)   # module's init_hidden()

    out, hidden = rnn_light_forward(x, h0, params)
    (out, hidden) = jax.block_until_ready((out, hidden))

    out_ref, hidden_ref = rnn_light_reference(x, h0, params)
    assert out.shape == (1, OUTPUT_SIZE) and hidden.shape == (2, 1, HIDDEN_SIZE)
    assert jnp.allclose(out, out_ref, atol=1e-5, rtol=1e-5)
    assert jnp.allclose(hidden, hidden_ref, atol=1e-5, rtol=1e-5)

    print("KERNEL_OK")
</pallas_src>

<mosaic_0001>
module attributes {stable_mosaic.version = 11 : i64} {
  func.func @kernel(%arg0: memref<202x64xf32, #tpu.memory_space<vmem>>, %arg1: memref<2x64xf32, #tpu.memory_space<vmem>>) attributes {dimension_semantics = [], scalar_prefetch = 0 : i64, scratch_operands = 0 : i64, tpu.core_type = #tpu.core_type<tc>} {
    %c0 = arith.constant 0 : index
    %c0_0 = arith.constant 0 : index
    %0 = vector.load %arg0[%c0, %c0_0] : memref<202x64xf32, #tpu.memory_space<vmem>>, vector<8x64xf32>
    %c8 = arith.constant 8 : index
    %c0_1 = arith.constant 0 : index
    %1 = vector.load %arg0[%c8, %c0_1] : memref<202x64xf32, #tpu.memory_space<vmem>>, vector<64x64xf32>
    %c72 = arith.constant 72 : index
    %c0_2 = arith.constant 0 : index
    %2 = vector.load %arg0[%c72, %c0_2] : memref<202x64xf32, #tpu.memory_space<vmem>>, vector<64x64xf32>
    %c136 = arith.constant 136 : index
    %c0_3 = arith.constant 0 : index
    %3 = vector.load %arg0[%c136, %c0_3] : memref<202x64xf32, #tpu.memory_space<vmem>>, vector<64x64xf32>
    %c200 = arith.constant 200 : index
    %c0_4 = arith.constant 0 : index
    %4 = vector.load %arg0[%c200, %c0_4] : memref<202x64xf32, #tpu.memory_space<vmem>>, vector<1x64xf32>
    %c201 = arith.constant 201 : index
    %c0_5 = arith.constant 0 : index
    %5 = vector.load %arg0[%c201, %c0_5] : memref<202x64xf32, #tpu.memory_space<vmem>>, vector<1x64xf32>
    %cst = arith.constant dense<0.000000e+00> : vector<8x64xf32>
    %6 = tpu.matmul %0, %1, %cst {dimension_numbers = #tpu.dot_dimension_numbers<[1], [0], [0], [1], [0, 0, 1, 1], [], []>} : vector<8x64xf32>, vector<64x64xf32>, vector<8x64xf32> -> vector<8x64xf32>
    %7 = vector.extract_strided_slice %6 {offsets = [0, 0], sizes = [1, 64], strides = [1, 1]} : vector<8x64xf32> to vector<1x64xf32>
    %cst_6 = arith.constant dense<0.000000e+00> : vector<1x64xf32>
    %8 = tpu.matmul %5, %2, %cst_6 {dimension_numbers = #tpu.dot_dimension_numbers<[1], [0], [0], [1], [0, 0, 1, 1], [], []>} : vector<1x64xf32>, vector<64x64xf32>, vector<1x64xf32> -> vector<1x64xf32>
    %9 = arith.addf %7, %8 : vector<1x64xf32>
    %10 = math.tanh %9 : vector<1x64xf32>
    %11 = vector.extract_strided_slice %6 {offsets = [1, 0], sizes = [1, 64], strides = [1, 1]} : vector<8x64xf32> to vector<1x64xf32>
    %cst_7 = arith.constant dense<0.000000e+00> : vector<1x64xf32>
    %12 = tpu.matmul %10, %2, %cst_7 {dimension_numbers = #tpu.dot_dimension_numbers<[1], [0], [0], [1], [0, 0, 1, 1], [], []>} : vector<1x64xf32>, vector<64x64xf32>, vector<1x64xf32> -> vector<1x64xf32>
    %13 = arith.addf %11, %12 : vector<1x64xf32>
    %14 = math.tanh %13 : vector<1x64xf32>
    %15 = vector.extract_strided_slice %6 {offsets = [2, 0], sizes = [1, 64], strides = [1, 1]} : vector<8x64xf32> to vector<1x64xf32>
    %cst_8 = arith.constant dense<0.000000e+00> : vector<1x64xf32>
    %16 = tpu.matmul %14, %2, %cst_8 {dimension_numbers = #tpu.dot_dimension_numbers<[1], [0], [0], [1], [0, 0, 1, 1], [], []>} : vector<1x64xf32>, vector<64x64xf32>, vector<1x64xf32> -> vector<1x64xf32>
    %17 = arith.addf %15, %16 : vector<1x64xf32>
    %18 = math.tanh %17 : vector<1x64xf32>
    %19 = vector.extract_strided_slice %6 {offsets = [3, 0], sizes = [1, 64], strides = [1, 1]} : vector<8x64xf32> to vector<1x64xf32>
    %cst_9 = arith.constant dense<0.000000e+00> : vector<1x64xf32>
    %20 = tpu.matmul %18, %2, %cst_9 {dimension_numbers = #tpu.dot_dimension_numbers<[1], [0], [0], [1], [0, 0, 1, 1], [], []>} : vector<1x64xf32>, vector<64x64xf32>, vector<1x64xf32> -> vector<1x64xf32>
    %21 = arith.addf %19, %20 : vector<1x64xf32>
    %22 = math.tanh %21 : vector<1x64xf32>
    %23 = vector.extract_strided_slice %6 {offsets = [4, 0], sizes = [1, 64], strides = [1, 1]} : vector<8x64xf32> to vector<1x64xf32>
    %cst_10 = arith.constant dense<0.000000e+00> : vector<1x64xf32>
    %24 = tpu.matmul %22, %2, %cst_10 {dimension_numbers = #tpu.dot_dimension_numbers<[1], [0], [0], [1], [0, 0, 1, 1], [], []>} : vector<1x64xf32>, vector<64x64xf32>, vector<1x64xf32> -> vector<1x64xf32>
    %25 = arith.addf %23, %24 : vector<1x64xf32>
    %26 = math.tanh %25 : vector<1x64xf32>
    %27 = vector.extract_strided_slice %6 {offsets = [5, 0], sizes = [1, 64], strides = [1, 1]} : vector<8x64xf32> to vector<1x64xf32>
    %cst_11 = arith.constant dense<0.000000e+00> : vector<1x64xf32>
    %28 = tpu.matmul %26, %2, %cst_11 {dimension_numbers = #tpu.dot_dimension_numbers<[1], [0], [0], [1], [0, 0, 1, 1], [], []>} : vector<1x64xf32>, vector<64x64xf32>, vector<1x64xf32> -> vector<1x64xf32>
    %29 = arith.addf %27, %28 : vector<1x64xf32>
    %30 = math.tanh %29 : vector<1x64xf32>
    %31 = vector.extract_strided_slice %6 {offsets = [6, 0], sizes = [1, 64], strides = [1, 1]} : vector<8x64xf32> to vector<1x64xf32>
    %cst_12 = arith.constant dense<0.000000e+00> : vector<1x64xf32>
    %32 = tpu.matmul %30, %2, %cst_12 {dimension_numbers = #tpu.dot_dimension_numbers<[1], [0], [0], [1], [0, 0, 1, 1], [], []>} : vector<1x64xf32>, vector<64x64xf32>, vector<1x64xf32> -> vector<1x64xf32>
    %33 = arith.addf %31, %32 : vector<1x64xf32>
    %34 = math.tanh %33 : vector<1x64xf32>
    %35 = vector.extract_strided_slice %6 {offsets = [7, 0], sizes = [1, 64], strides = [1, 1]} : vector<8x64xf32> to vector<1x64xf32>
    %cst_13 = arith.constant dense<0.000000e+00> : vector<1x64xf32>
    %36 = tpu.matmul %34, %2, %cst_13 {dimension_numbers = #tpu.dot_dimension_numbers<[1], [0], [0], [1], [0, 0, 1, 1], [], []>} : vector<1x64xf32>, vector<64x64xf32>, vector<1x64xf32> -> vector<1x64xf32>
    %37 = arith.addf %35, %36 : vector<1x64xf32>
    %38 = math.tanh %37 : vector<1x64xf32>
    %c1 = arith.constant 1 : index
    %c0_14 = arith.constant 0 : index
    %39 = vector.load %arg1[%c1, %c0_14] : memref<2x64xf32, #tpu.memory_space<vmem>>, vector<1x64xf32>
    tpu.vector_store %arg1[%c1, %c0_14], %38 {strides = array<i32>} : memref<2x64xf32, #tpu.memory_space<vmem>>, vector<1x64xf32>,
    %cst_15 = arith.constant dense<0.000000e+00> : vector<1x64xf32>
    %40 = tpu.matmul %38, %3, %cst_15 {dimension_numbers = #tpu.dot_dimension_numbers<[1], [0], [0], [1], [0, 0, 1, 1], [], []>} : vector<1x64xf32>, vector<64x64xf32>, vector<1x64xf32> -> vector<1x64xf32>
    %41 = arith.addf %40, %4 : vector<1x64xf32>
    %cst_16 = arith.constant dense<0xFF800000> : vector<1xf32>
    %42 = vector.multi_reduction <maximumf>, %41, %cst_16 [1] : vector<1x64xf32> to vector<1xf32>
    %43 = vector.shape_cast %42 : vector<1xf32> to vector<1x1xf32>
    %44 = vector.broadcast %43 : vector<1x1xf32> to vector<1x64xf32>
    %45 = arith.subf %41, %44 : vector<1x64xf32>
    %46 = math.exp %45 : vector<1x64xf32>
    %cst_17 = arith.constant dense<0.000000e+00> : vector<1xf32>
    %47 = vector.multi_reduction <add>, %46, %cst_17 [1] : vector<1x64xf32> to vector<1xf32>
    %48 = vector.shape_cast %47 : vector<1xf32> to vector<1x1xf32>
    %49 = math.log %48 : vector<1x1xf32>
    %50 = vector.broadcast %49 : vector<1x1xf32> to vector<1x64xf32>
    %51 = arith.subf %45, %50 : vector<1x64xf32>
    %c0_18 = arith.constant 0 : index
    %c0_19 = arith.constant 0 : index
    %52 = vector.load %arg1[%c0_18, %c0_19] : memref<2x64xf32, #tpu.memory_space<vmem>>, vector<1x64xf32>
    tpu.vector_store %arg1[%c0_18, %c0_19], %51 {strides = array<i32>} : memref<2x64xf32, #tpu.memory_space<vmem>>, vector<1x64xf32>,
    return
  }
}

</mosaic_0001>

<bundles_post_ra>
// kernel: rnn_light_forward.1
= control target key start
LH: loop header
LB: loop body
LE: loop exit
PB: predicated region body
PF: predicated region fallthrough
CT: control target
= control target key end

     0   :  { %vm35_vm0 = vcmask 523264   ;;  %vm286_vm1 = vcmask 523271   ;;  %vm312_vm2 = vcmask 516096   ;;  %s540_s0 = inlined_call_operand.vmem [shape: f32[202,64], index: 0, kind: input, shape index: {}]   ;;  %s541_s1 = inlined_call_operand.vmem [shape: f32[2,64], index: 1, kind: output, shape index: {}]  }
   0x1   :  { %v16_v0 = vld [vmem:[%s540_s0 + $0x40] sm:$0xff]  ;;  %v15_v2 = vld [vmem:[%s540_s0 + $0x38] sm:$0xff]  ;;  %v14_v4 = vld [vmem:[%s540_s0 + $0x30] sm:$0xff] }
   0x2   :  { %v376_v1 = vld [vmem:[%s540_s0 + $0x80] sm:$0xff]  ;;  %47 = vmatpush.msra.mxu0 %v16_v0  ;;  %v385_v3 = vld [vmem:[%s540_s0 + $0x78] sm:$0xff]  ;;  %v393_v5 = vld [vmem:[%s540_s0 + $0x70] sm:$0xff] }
   0x3   :  { %70 = vmatpush.msra.mxu1 %v376_v1  ;;  %95 = vmatpush.msra.mxu2 %v376_v1  ;;  %v13_v6 = vld [vmem:[%s540_s0 + $0x28] sm:$0xff]  ;;  %v12_v8 = vld [vmem:[%s540_s0 + $0x20] sm:$0xff]  ;;  %v11_v10 = vld [vmem:[%s540_s0 + $0x18] sm:$0xff] }
   0x4   :  { %124 = vmatpush.msra.mxu3 %v376_v1  ;;  %48 = vmatpush.msra.mxu0 %v15_v2  ;;  %v404_v7 = vld [vmem:[%s540_s0 + $0x68] sm:$0xff]  ;;  %v415_v9 = vld [vmem:[%s540_s0 + $0x60] sm:$0xff]  ;;  %v426_v11 = vld [vmem:[%s540_s0 + $0x58] sm:$0xff] }
   0x5   :  { %71 = vmatpush.msra.mxu1 %v385_v3  ;;  %96 = vmatpush.msra.mxu2 %v385_v3  ;;  %v10_v12 = vld [vmem:[%s540_s0 + $0x10] sm:$0xff]  ;;  %v9_v14 = vld [vmem:[%s540_s0 + $0x8] sm:$0xff]  ;;  %v8_v16 = vld [vmem:[%s540_s0] sm:$0xff] }
   0x6   :  { %125 = vmatpush.msra.mxu3 %v385_v3  ;;  %49 = vmatpush.msra.mxu0 %v14_v4  ;;  %v18_v13 = vld [vmem:[%s540_s0 + $0x50] sm:$0xff]  ;;  %v17_v15 = vld [vmem:[%s540_s0 + $0x48] sm:$0xff]  ;;  %v32_v47 = vld [vmem:[%s540_s0 + $0xc0] sm:$0xff] }
   0x7   :  { %72 = vmatpush.msra.mxu1 %v393_v5  ;;  %97 = vmatpush.msra.mxu2 %v393_v5  ;;  %v34_v17 = vld [vmem:[%s540_s0 + $0xc9] sm:$0x1]  ;;  %v31_v53 = vld [vmem:[%s540_s0 + $0xb8] sm:$0xff]  ;;  %v30_v54 = vld [vmem:[%s540_s0 + $0xb0] sm:$0xff] }
   0x8   :  { %126 = vmatpush.msra.mxu3 %v393_v5  ;;  %50 = vmatpush.msra.mxu0 %v13_v6  ;;  %v29_v55 = vld [vmem:[%s540_s0 + $0xa8] sm:$0xff]  ;;  %v28_v56 = vld [vmem:[%s540_s0 + $0xa0] sm:$0xff]  ;;  %v27_v57 = vld [vmem:[%s540_s0 + $0x98] sm:$0xff] }
   0x9   :  { %73 = vmatpush.msra.mxu1 %v404_v7  ;;  %98 = vmatpush.msra.mxu2 %v404_v7  ;;  %v26_v58 = vld [vmem:[%s540_s0 + $0x90] sm:$0xff]  ;;  %v25_v59 = vld [vmem:[%s540_s0 + $0x88] sm:$0xff] }
   0xa   :  { %127 = vmatpush.msra.mxu3 %v404_v7  ;;  %51 = vmatpush.msra.mxu0 %v12_v8 }
   0xb   :  { %74 = vmatpush.msra.mxu1 %v415_v9  ;;  %99 = vmatpush.msra.mxu2 %v415_v9 }
   0xc   :  { %128 = vmatpush.msra.mxu3 %v415_v9  ;;  %52 = vmatpush.msra.mxu0 %v11_v10 }
   0xd   :  { %75 = vmatpush.msra.mxu1 %v426_v11  ;;  %100 = vmatpush.msra.mxu2 %v426_v11 }
   0xe   :  { %129 = vmatpush.msra.mxu3 %v426_v11  ;;  %53 = vmatpush.msra.mxu0 %v10_v12 }
   0xf   :  { %76 = vmatpush.msra.mxu1 %v18_v13  ;;  %101 = vmatpush.msra.mxu2 %v18_v13 }
  0x10   :  { %130 = vmatpush.msra.mxu3 %v18_v13  ;;  %54 = vmatpush.msra.mxu0 %v9_v14 }
  0x11   :  { %77 = vmatpush.msra.mxu1 %v17_v15  ;;  %330 = vmatmul.msk.f32.vlgmr.msra.gmra.mxu0 %vm35_vm0, %v8_v16 }
  0x12   :  { %331 = vmatmul.msk.f32.vlgmr.msra.gmra.mxu1 %vm35_vm0, %v34_v17  ;;  %102 = vmatpush.msra.mxu2 %v17_v15 }
  0x13   :  { %131 = vmatpush.msra.mxu3 %v17_v15  ;;  %153 = vmatpush.msrb.mxu0 %v376_v1 }
  0x14   :  { %182 = vmatpush.msrb.mxu1 %v376_v1  ;;  %211 = vmatpush.msrb.mxu2 %v376_v1 }
  0x15   :  { %240 = vmatpush.msrb.mxu3 %v376_v1  ;;  %154 = vmatpush.msrb.mxu0 %v385_v3 }
  0x16   :  { %183 = vmatpush.msrb.mxu1 %v385_v3  ;;  %212 = vmatpush.msrb.mxu2 %v385_v3 }
  0x17   :  { %241 = vmatpush.msrb.mxu3 %v385_v3  ;;  %155 = vmatpush.msrb.mxu0 %v393_v5 }
  0x18   :  { %184 = vmatpush.msrb.mxu1 %v393_v5  ;;  %213 = vmatpush.msrb.mxu2 %v393_v5 }
  0x19   :  { %242 = vmatpush.msrb.mxu3 %v393_v5  ;;  %156 = vmatpush.msrb.mxu0 %v404_v7 }
  0x1a   :  { %185 = vmatpush.msrb.mxu1 %v404_v7  ;;  %214 = vmatpush.msrb.mxu2 %v404_v7 }
  0x1b   :  { %243 = vmatpush.msrb.mxu3 %v404_v7  ;;  %157 = vmatpush.msrb.mxu0 %v415_v9 }
  0x1c   :  { %186 = vmatpush.msrb.mxu1 %v415_v9  ;;  %215 = vmatpush.msrb.mxu2 %v415_v9 }
  0x1d   :  { %244 = vmatpush.msrb.mxu3 %v415_v9  ;;  %158 = vmatpush.msrb.mxu0 %v426_v11 }
  0x1e   :  { %187 = vmatpush.msrb.mxu1 %v426_v11  ;;  %216 = vmatpush.msrb.mxu2 %v426_v11 }
  0x1f   :  { %245 = vmatpush.msrb.mxu3 %v426_v11  ;;  %159 = vmatpush.msrb.mxu0 %v18_v13 }
  0x20   :  { %188 = vmatpush.msrb.mxu1 %v18_v13  ;;  %217 = vmatpush.msrb.mxu2 %v18_v13 }
  0x21   :  { %246 = vmatpush.msrb.mxu3 %v18_v13  ;;  %160 = vmatpush.msrb.mxu0 %v17_v15 }
  0x22   :  { %189 = vmatpush.msrb.mxu1 %v17_v15  ;;  %218 = vmatpush.msrb.mxu2 %v17_v15 }
  0x23   :  { %247 = vmatpush.msrb.mxu3 %v17_v15  ;;  %269 = vmatpush.msra.mxu0 %v376_v1  ;;  %v33_v1 = vld [vmem:[%s540_s0 + $0xc8] sm:$0x1] }
  0x24   :  { %300 = vmatpush.msra.mxu1 %v32_v47 }
  0x25   :  { %270 = vmatpush.msra.mxu0 %v385_v3 }
  0x26   :  { %301 = vmatpush.msra.mxu1 %v31_v53 }
  0x27   :  { %271 = vmatpush.msra.mxu0 %v393_v5 }
  0x28   :  { %302 = vmatpush.msra.mxu1 %v30_v54 }
  0x29   :  { %272 = vmatpush.msra.mxu0 %v404_v7 }
  0x2a   :  { %303 = vmatpush.msra.mxu1 %v29_v55 }
  0x2b   :  { %273 = vmatpush.msra.mxu0 %v415_v9 }
  0x2c   :  { %304 = vmatpush.msra.mxu1 %v28_v56 }
  0x2d   :  { %274 = vmatpush.msra.mxu0 %v426_v11 }
  0x2e   :  { %305 = vmatpush.msra.mxu1 %v27_v57 }
  0x2f   :  { %275 = vmatpush.msra.mxu0 %v18_v13 }
  0x30   :  { %306 = vmatpush.msra.mxu1 %v26_v58 }
  0x31   :  { %276 = vmatpush.msra.mxu0 %v17_v15 }
  0x32   :  { %307 = vmatpush.msra.mxu1 %v25_v59 }
  0x8e   :  { %v486_v18 = vpop.f32.mrf.mxu0 }
  0x8f   :  { %v79_v19 = vpop.f32.mrf.mxu1 }
  0x90   :  { %v82_v20 = vadd.f32 %v79_v19, %v486_v18 }
  0x92   :  { %340 = vtanh.f32 %v82_v20 }
  0x98   :  { %v341_v21 = vpop.eup %340 }
  0x99   :  { %332 = vmatmul.msk.f32.vlgmr.msra.gmra.mxu2 %vm35_vm0, %v341_v21 }
 0x11c   :  { %v104_v22 = vpop.f32.mrf.mxu2 }
 0x11d   :  { %v108_v23 = vrot.slane %v104_v22, 7 }
 0x11f   :  { %v110_v24 = vadd.f32 %v108_v23, %v486_v18 }
 0x121   :  { %342 = vtanh.f32 %v110_v24 }
 0x127   :  { %v343_v25 = vpop.eup %342 }
 0x128   :  { %v113_v26 = vrot.slane %v343_v25, 1 }
 0x12a   :  { %333 = vmatmul.msk.f32.vlgmr.msra.gmra.mxu3 %vm35_vm0, %v113_v26 }
 0x1ad   :  { %v133_v27 = vpop.f32.mrf.mxu3 }
 0x1ae   :  { %v137_v28 = vrot.slane %v133_v27, 6 }
 0x1b0   :  { %v139_v29 = vadd.f32 %v137_v28, %v486_v18 }
 0x1b2   :  { %344 = vtanh.f32 %v139_v29 }
 0x1b8   :  { %v345_v30 = vpop.eup %344 }
 0x1b9   :  { %v142_v31 = vrot.slane %v345_v30, 2 }
 0x1bb   :  { %334 = vmatmul.msk.f32.vlgmr.msrb.gmra.mxu0 %vm35_vm0, %v142_v31 }
 0x238   :  { %v162_v32 = vpop.f32.mrf.mxu0 }
 0x239   :  { %v166_v33 = vrot.slane %v162_v32, 5 }
 0x23b   :  { %v168_v34 = vadd.f32 %v166_v33, %v486_v18 }
 0x23d   :  { %346 = vtanh.f32 %v168_v34 }
 0x243   :  { %v347_v35 = vpop.eup %346 }
 0x244   :  { %v171_v36 = vrot.slane %v347_v35, 3 }
 0x246   :  { %335 = vmatmul.msk.f32.vlgmr.msrb.gmra.mxu1 %vm35_vm0, %v171_v36 }
 0x2c3   :  { %v191_v37 = vpop.f32.mrf.mxu1 }
 0x2c4   :  { %v195_v38 = vrot.slane %v191_v37, 4 }
 0x2c6   :  { %v197_v39 = vadd.f32 %v195_v38, %v486_v18 }
 0x2c8   :  { %348 = vtanh.f32 %v197_v39 }
 0x2ce   :  { %v349_v40 = vpop.eup %348 }
 0x2cf   :  { %v200_v41 = vrot.slane %v349_v40, 4 }
 0x2d1   :  { %336 = vmatmul.msk.f32.vlgmr.msrb.gmra.mxu2 %vm35_vm0, %v200_v41 }
 0x354   :  { %v220_v42 = vpop.f32.mrf.mxu2 }
 0x355   :  { %v224_v43 = vrot.slane %v220_v42, 3 }
 0x357   :  { %v226_v44 = vadd.f32 %v224_v43, %v486_v18 }
 0x359   :  { %350 = vtanh.f32 %v226_v44 }
 0x35f   :  { %v351_v45 = vpop.eup %350 }
 0x360   :  { %v229_v46 = vrot.slane %v351_v45, 5 }
 0x362   :  { %337 = vmatmul.msk.f32.vlgmr.msrb.gmra.mxu3 %vm35_vm0, %v229_v46 }
 0x3e5   :  { %v249_v48 = vpop.f32.mrf.mxu3 }
 0x3e6   :  { %v253_v49 = vrot.slane %v249_v48, 2 }
 0x3e8   :  { %v255_v50 = vadd.f32 %v253_v49, %v486_v18 }
 0x3ea   :  { %352 = vtanh.f32 %v255_v50 }
 0x3f0   :  { %v353_v51 = vpop.eup %352 }
 0x3f1   :  { %v258_v52 = vrot.slane %v353_v51, 6 }
 0x3f3   :  { %338 = vmatmul.msk.f32.vlgmr.msra.gmra.mxu0 %vm35_vm0, %v258_v52 }
 0x470   :  { %v278_v60 = vpop.f32.mrf.mxu0 }
 0x471   :  { %v282_v61 = vrot.slane %v278_v60, 1 }
 0x473   :  { %v284_v62 = vadd.f32 %v282_v61, %v486_v18 }
 0x475   :  { %354 = vtanh.f32 %v284_v62 }
 0x47b   :  { %v355_v63 = vpop.eup %354 }
 0x47c   :  { %v289_v0 = vrot.slane %v355_v63, 7  ;;  %287 = vst.msk [vmem:[%s541_s1 - $0x6] sm:$0x80] %vm286_vm1, %v355_v63 }
 0x47e   :  { %339 = vmatmul.msk.f32.vlgmr.msra.gmra.mxu1 %vm35_vm0, %v289_v0 }
 0x4fb   :  { %v309_v2 = vpop.f32.mrf.mxu1 }
 0x4fc   :  { %v310_v3 = vadd.f32 %v309_v2, %v33_v1 }
 0x4fe   :  { %v313_v4 = vsel %vm312_vm2, %v310_v3, -inf }
 0x4ff   :  { %314 = vmax.xlane.f32.xlu0 %v313_v4 }
 0x572   :  { %v315_v5 = vpop.xlane.xlu0 %314 }
 0x573   :  { %v316_v6 = vsub.f32 %v310_v3, %v315_v5 }
 0x575   :  { %v317_v7 = vmul.f32 1.442695, %v316_v6 }
 0x577   :  { %356 = vpow2.f32 %v317_v7 }
 0x57d   :  { %v357_v8 = vpop.eup %356 }
 0x57e   :  { %v319_v9 = vsel %vm312_vm2, %v357_v8, 0.0 }
 0x57f   :  { %320 = vadd.xlane.f32.xlu0 %v319_v9 }
 0x5f2   :  { %v321_v10 = vpop.xlane.xlu0 %320 }
 0x5f3   :  { %358 = vlog2.f32 %v321_v10 }
 0x5f9   :  { %v359_v11 = vpop.eup %358 }
 0x5fa   :  { %v323_v12 = vmul.f32 0.6931472, %v359_v11 }
 0x5fc   :  { %v324_v13 = vsub.f32 %v316_v6, %v323_v12 }
 0x5fe   :  { %325 = vst.msk [vmem:[%s541_s1] sm:$0x1] %vm312_vm2, %v324_v13 }

</bundles_post_ra>
